<compile_context>
chip_gen: v5e
topology: v5e:2x2
jax: 0.10.0
libtpu: 0.0.40
codegen_flags: <defaults>
</compile_context>

<pallas_src>
import jax
import jax.numpy as jnp
from jax.experimental import pallas as pl
from jax.experimental.pallas import tpu as pltpu

STATE_DIM = 3      # Pendulum-v0 observation_space.shape[0]
ACTION_DIM = 1     # Pendulum-v0 action_space.shape[0]
HIDDEN = 64
MAX_ACTION = 2.0   # Pendulum-v0 action_space.high[0]


def _round_up(n, m):
    return ((n + m - 1) // m) * m


def _actor_kernel(xT_ref, w1_ref, b1_ref, w2_ref, b2_ref, w3_ref, b3_ref,
                  out_ref):
    """One batch tile. Batch lives on the lane axis throughout.

    xT_ref : (STATE_DIM, TILE_B)   input tile, transposed
    w1_ref : (HIDDEN, STATE_DIM)   = l1.weight (out, in)
    b1_ref : (HIDDEN, 1)           = l1.bias[:, None]
    w2_ref : (HIDDEN, HIDDEN)      = l2.weight
    b2_ref : (HIDDEN, 1)
    w3_ref : (HIDDEN, ACTION_DIM)  = l3.weight.T   (column vector)
    b3_ref : (ACTION_DIM, 1)
    out_ref: (ACTION_DIM, TILE_B)  lane-dense output slab
    """
    xT = xT_ref[...]                                               # (3, TILE_B)

    # Layer 1: MXU matmul, f32 accumulation; bias is a (64,1) column that
    # broadcasts across the lane (batch) axis.
    h1 = jnp.dot(w1_ref[...], xT, preferred_element_type=jnp.float32)
    h1 = jnp.maximum(h1 + b1_ref[...], 0.0)                        # (64, TILE_B)

    # Layer 2: MXU matmul (K = N_lanes = 64 / TILE_B -> good utilization).
    h2 = jnp.dot(w2_ref[...], h1, preferred_element_type=jnp.float32)
    h2 = jnp.maximum(h2 + b2_ref[...], 0.0)                        # (64, TILE_B)

    # Layer 3 (output width 1): VPU multiply + sublane (XLU) reduction instead
    # of an N=1 MXU matmul.  Result is already lane-dense in batch.
    h3 = jnp.sum(h2 * w3_ref[...], axis=0, keepdims=True)          # (1, TILE_B)
    h3 = h3 + b3_ref[...]

    out_ref[...] = (MAX_ACTION * jnp.tanh(h3)).astype(out_ref.dtype)


def actor_forward(x, params, *, tile_b=1024):
    """x: (batch, STATE_DIM) float32 -> (batch, ACTION_DIM) float32.

    tile_b: batch rows per grid step (multiple of 128).  1024 is comfortably
    inside the scoped-VMEM budget on v5e/v6e/v7x; up to ~4096 is still safe on
    v7x's 64 MiB VMEM.
    """
    w1, b1, w2, b2, w3, b3 = params
    batch = x.shape[0]
    assert tile_b % 128 == 0, "tile_b must be a multiple of the 128-lane width"

    # Shrink the tile for small batches; pad batch to a multiple of the tile.
    tile_b = min(tile_b, _round_up(batch, 128))
    b_pad = _round_up(batch, tile_b)

    # Layout plumbing (not compute): present batch on the lane axis, padded.
    xT = jnp.zeros((STATE_DIM, b_pad), x.dtype).at[:, :batch].set(x.T)

    grid = (b_pad // tile_b,)

    def _resident(a):
        # Full-array block, constant index_map -> stays in VMEM across steps.
        return pl.BlockSpec(a.shape, lambda i: (0, 0))

    out_t = pl.pallas_call(
        _actor_kernel,
        out_shape=jax.ShapeDtypeStruct((ACTION_DIM, b_pad), jnp.float32),
        grid=grid,
        in_specs=[
            pl.BlockSpec((STATE_DIM, tile_b), lambda i: (0, i)),   # x tile
            _resident(w1), _resident(b1),
            _resident(w2), _resident(b2),
            _resident(w3), _resident(b3),
        ],
        out_specs=pl.BlockSpec((ACTION_DIM, tile_b), lambda i: (0, i)),
        compiler_params=pltpu.CompilerParams(
            dimension_semantics=("parallel",),   # shard batch tiles across TCs (v7x)
        ),
    )(xT, w1, b1, w2, b2, w3, b3)

    return out_t[:, :batch].T                                       # (batch, 1)


def init_params(key):
    """Deterministic synthetic parameters (PyTorch-style layouts, see kernel doc)."""
    ks = jax.random.split(key, 6)
    w1 = jax.random.normal(ks[0], (HIDDEN, STATE_DIM), jnp.float32) * 0.1    # l1.weight
    b1 = jax.random.normal(ks[1], (HIDDEN, 1), jnp.float32) * 0.1            # l1.bias[:,None]
    w2 = jax.random.normal(ks[2], (HIDDEN, HIDDEN), jnp.float32) * 0.1       # l2.weight
    b2 = jax.random.normal(ks[3], (HIDDEN, 1), jnp.float32) * 0.1
    w3 = jax.random.normal(ks[4], (HIDDEN, ACTION_DIM), jnp.float32) * 0.1   # l3.weight.T
    b3 = jax.random.normal(ks[5], (ACTION_DIM, 1), jnp.float32) * 0.1
    return (w1, b1, w2, b2, w3, b3)


def actor_forward_ref(x, params):
    """Pure-JAX reference matching the PyTorch forward."""
    w1, b1, w2, b2, w3, b3 = params
    h1 = jax.nn.relu(x @ w1.T + b1[:, 0])
    h2 = jax.nn.relu(h1 @ w2.T + b2[:, 0])
    return MAX_ACTION * jnp.tanh(h2 @ w3 + b3[:, 0])


if __name__ == "__main__":
    key = jax.random.PRNGKey(0)
    k_x, k_p, k_x2 = jax.random.split(key, 3)
    params = init_params(k_p)

    # Small demo batch (single grid step, tile shrinks to 128).
    x_small = jax.random.normal(k_x, (8, STATE_DIM), jnp.float32)
    out_small = actor_forward(x_small, params)
    jax.block_until_ready(out_small)
    ref_small = actor_forward_ref(x_small, params)
    assert out_small.shape == (8, ACTION_DIM)
    assert jnp.allclose(out_small, ref_small, atol=1e-4, rtol=1e-4)

    # Non-multiple batch exercising the batch grid (grid=4) and padding path.
    x_big = jax.random.normal(k_x2, (1000, STATE_DIM), jnp.float32)
    out_big = actor_forward(x_big, params, tile_b=256)
    jax.block_until_ready(out_big)
    ref_big = actor_forward_ref(x_big, params)
    assert out_big.shape == (1000, ACTION_DIM)
    assert jnp.allclose(out_big, ref_big, atol=1e-4, rtol=1e-4)

    print("KERNEL_OK")
</pallas_src>

<mosaic_0001>
module attributes {stable_mosaic.version = 11 : i64} {
  func.func @_actor_kernel(%arg0: i32, %arg1: memref<3x128xf32, #tpu.memory_space<vmem>>, %arg2: memref<64x3xf32, #tpu.memory_space<vmem>>, %arg3: memref<64x1xf32, #tpu.memory_space<vmem>>, %arg4: memref<64x64xf32, #tpu.memory_space<vmem>>, %arg5: memref<64x1xf32, #tpu.memory_space<vmem>>, %arg6: memref<64x1xf32, #tpu.memory_space<vmem>>, %arg7: memref<1x1xf32, #tpu.memory_space<vmem>>, %arg8: memref<1x128xf32, #tpu.memory_space<vmem>>) attributes {dimension_semantics = [#tpu.dimension_semantics<parallel>], iteration_bounds = array<i64: 1>, scalar_prefetch = 0 : i64, scratch_operands = 0 : i64, tpu.core_type = #tpu.core_type<tc>, window_params = [{transform_indices = @transform_0, window_bounds = array<i64: 3, 128>}, {pipeline_mode = #tpu.pipeline_mode<synchronous>, transform_indices = @transform_1, window_bounds = array<i64: 64, 3>}, {pipeline_mode = #tpu.pipeline_mode<synchronous>, transform_indices = @transform_2, window_bounds = array<i64: 64, 1>}, {pipeline_mode = #tpu.pipeline_mode<synchronous>, transform_indices = @transform_3, window_bounds = array<i64: 64, 64>}, {pipeline_mode = #tpu.pipeline_mode<synchronous>, transform_indices = @transform_4, window_bounds = array<i64: 64, 1>}, {pipeline_mode = #tpu.pipeline_mode<synchronous>, transform_indices = @transform_5, window_bounds = array<i64: 64, 1>}, {pipeline_mode = #tpu.pipeline_mode<synchronous>, transform_indices = @transform_6, window_bounds = array<i64: 1, 1>}, {transform_indices = @transform_7, window_bounds = array<i64: 1, 128>}]} {
    %c0 = arith.constant 0 : index
    %c0_0 = arith.constant 0 : index
    %0 = vector.load %arg1[%c0, %c0_0] : memref<3x128xf32, #tpu.memory_space<vmem>>, vector<3x128xf32>
    %c0_1 = arith.constant 0 : index
    %c0_2 = arith.constant 0 : index
    %1 = vector.load %arg2[%c0_1, %c0_2] : memref<64x3xf32, #tpu.memory_space<vmem>>, vector<64x3xf32>
    %cst = arith.constant dense<0.000000e+00> : vector<64x128xf32>
    %2 = tpu.matmul %1, %0, %cst {dimension_numbers = #tpu.dot_dimension_numbers<[1], [0], [0], [1], [0, 0, 1, 1], [], []>} : vector<64x3xf32>, vector<3x128xf32>, vector<64x128xf32> -> vector<64x128xf32>
    %c0_3 = arith.constant 0 : index
    %c0_4 = arith.constant 0 : index
    %3 = vector.load %arg3[%c0_3, %c0_4] : memref<64x1xf32, #tpu.memory_space<vmem>>, vector<64x1xf32>
    %4 = vector.broadcast %3 : vector<64x1xf32> to vector<64x128xf32>
    %5 = arith.addf %2, %4 : vector<64x128xf32>
    %cst_5 = arith.constant 0.000000e+00 : f32
    %6 = vector.broadcast %cst_5 : f32 to vector<64x128xf32>
    %7 = arith.maximumf %5, %6 : vector<64x128xf32>
    %c0_6 = arith.constant 0 : index
    %c0_7 = arith.constant 0 : index
    %8 = vector.load %arg4[%c0_6, %c0_7] : memref<64x64xf32, #tpu.memory_space<vmem>>, vector<64x64xf32>
    %cst_8 = arith.constant dense<0.000000e+00> : vector<64x128xf32>
    %9 = tpu.matmul %8, %7, %cst_8 {dimension_numbers = #tpu.dot_dimension_numbers<[1], [0], [0], [1], [0, 0, 1, 1], [], []>} : vector<64x64xf32>, vector<64x128xf32>, vector<64x128xf32> -> vector<64x128xf32>
    %c0_9 = arith.constant 0 : index
    %c0_10 = arith.constant 0 : index
    %10 = vector.load %arg5[%c0_9, %c0_10] : memref<64x1xf32, #tpu.memory_space<vmem>>, vector<64x1xf32>
    %11 = vector.broadcast %10 : vector<64x1xf32> to vector<64x128xf32>
    %12 = arith.addf %9, %11 : vector<64x128xf32>
    %cst_11 = arith.constant 0.000000e+00 : f32
    %13 = vector.broadcast %cst_11 : f32 to vector<64x128xf32>
    %14 = arith.maximumf %12, %13 : vector<64x128xf32>
    %c0_12 = arith.constant 0 : index
    %c0_13 = arith.constant 0 : index
    %15 = vector.load %arg6[%c0_12, %c0_13] : memref<64x1xf32, #tpu.memory_space<vmem>>, vector<64x1xf32>
    %16 = vector.broadcast %15 : vector<64x1xf32> to vector<64x128xf32>
    %17 = arith.mulf %14, %16 : vector<64x128xf32>
    %cst_14 = arith.constant dense<0.000000e+00> : vector<128xf32>
    %18 = vector.multi_reduction <add>, %17, %cst_14 [0] : vector<64x128xf32> to vector<128xf32>
    %19 = vector.shape_cast %18 : vector<128xf32> to vector<1x128xf32>
    %c0_15 = arith.constant 0 : index
    %c0_16 = arith.constant 0 : index
    %20 = vector.load %arg7[%c0_15, %c0_16] : memref<1x1xf32, #tpu.memory_space<vmem>>, vector<1x1xf32>
    %21 = vector.broadcast %20 : vector<1x1xf32> to vector<1x128xf32>
    %22 = arith.addf %19, %21 : vector<1x128xf32>
    %23 = math.tanh %22 : vector<1x128xf32>
    %cst_17 = arith.constant 2.000000e+00 : f32
    %24 = vector.broadcast %cst_17 : f32 to vector<1x128xf32>
    %25 = arith.mulf %24, %23 : vector<1x128xf32>
    %c0_18 = arith.constant 0 : index
    %c0_19 = arith.constant 0 : index
    %26 = vector.load %arg8[%c0_18, %c0_19] : memref<1x128xf32, #tpu.memory_space<vmem>>, vector<1x128xf32>
    tpu.vector_store %arg8[%c0_18, %c0_19], %25 {strides = array<i32>} : memref<1x128xf32, #tpu.memory_space<vmem>>, vector<1x128xf32>,
    return
  }
  func.func @transform_0(%arg0: i32) -> (i32, i32) {
    %c0_i32 = arith.constant 0 : i32
    %c0_i32_0 = arith.constant 0 : i32
    return %c0_i32, %arg0 : i32, i32
  }
  func.func @transform_1(%arg0: i32) -> (i32, i32) {
    %c0_i32 = arith.constant 0 : i32
    %c0_i32_0 = arith.constant 0 : i32
    %c0_i32_1 = arith.constant 0 : i32
    return %c0_i32, %c0_i32_0 : i32, i32
  }
  func.func @transform_2(%arg0: i32) -> (i32, i32) {
    %c0_i32 = arith.constant 0 : i32
    %c0_i32_0 = arith.constant 0 : i32
    %c0_i32_1 = arith.constant 0 : i32
    return %c0_i32, %c0_i32_0 : i32, i32
  }
  func.func @transform_3(%arg0: i32) -> (i32, i32) {
    %c0_i32 = arith.constant 0 : i32
    %c0_i32_0 = arith.constant 0 : i32
    %c0_i32_1 = arith.constant 0 : i32
    return %c0_i32, %c0_i32_0 : i32, i32
  }
  func.func @transform_4(%arg0: i32) -> (i32, i32) {
    %c0_i32 = arith.constant 0 : i32
    %c0_i32_0 = arith.constant 0 : i32
    %c0_i32_1 = arith.constant 0 : i32
    return %c0_i32, %c0_i32_0 : i32, i32
  }
  func.func @transform_5(%arg0: i32) -> (i32, i32) {
    %c0_i32 = arith.constant 0 : i32
    %c0_i32_0 = arith.constant 0 : i32
    %c0_i32_1 = arith.constant 0 : i32
    return %c0_i32, %c0_i32_0 : i32, i32
  }
  func.func @transform_6(%arg0: i32) -> (i32, i32) {
    %c0_i32 = arith.constant 0 : i32
    %c0_i32_0 = arith.constant 0 : i32
    %c0_i32_1 = arith.constant 0 : i32
    return %c0_i32, %c0_i32_0 : i32, i32
  }
  func.func @transform_7(%arg0: i32) -> (i32, i32) {
    %c0_i32 = arith.constant 0 : i32
    %c0_i32_0 = arith.constant 0 : i32
    return %c0_i32, %arg0 : i32, i32
  }
}

</mosaic_0001>

<bundles_post_ra>
// kernel: tpu_custom_call.1
= control target key start
LH: loop header
LB: loop body
LE: loop exit
PB: predicated region body
PF: predicated region fallthrough
CT: control target
= control target key end

     0   :  { %s644_s0 = inlined_call_operand.vmem [shape: f32[3,128], index: 0, kind: input, shape index: {}]   ;;  %s645_s1 = inlined_call_operand.vmem [shape: f32[64,3], index: 1, kind: input, shape index: {}]   ;;  %s646_s2 = inlined_call_operand.vmem [shape: f32[64,1], index: 2, kind: input, shape index: {}]   ;;  %s647_s3 = inlined_call_operand.vmem [shape: f32[64,64], index: 3, kind: input, shape index: {}]   ;;  %s648_s4 = inlined_call_operand.vmem [shape: f32[64,1], index: 4, kind: input, shape index: {}]   ;;  %s649_s5 = inlined_call_operand.vmem [shape: f32[64,1], index: 5, kind: input, shape index: {}]   ;;  %s650_s6 = inlined_call_operand.<no memory space> [shape: f32[1,1], index: 6, kind: input, shape index: {}]   ;;  %s651_s7 = inlined_call_operand.hbm [shape: f32[1,128], index: 7, kind: output, shape index: {}]  }
   0x1   :  { %v12_v0 = vstv %s650_s6 }
   0x2   :  { %13 = vst [vmem:[#allocation2] sm:$0x1] %v12_v0 }
   0x3   :  { %v29_v1 = vld [vmem:[%s644_s0] sm:$0x7]  ;;  %vm111_vm0 = vcmask 1042432   ;;  %v45_v2 = vld [vmem:[%s646_s2 + $0x38] sm:$0xff]  ;;  %v43_v3 = vld [vmem:[%s646_s2 + $0x28] sm:$0xff]  ;;  %v457_v4 = vmov 0  }
   0x4   :  { %427 = vset.pattern.permute.xlu1 %v457_v4  ;;  %426 = vset.pattern.permute.xlu0 %v457_v4  ;;  %v30_v5 = vld [vmem:[%s645_s1] sm:$0xff]  ;;  %vm86_vm1 = vcmask 23552   ;;  %v35_v6 = vld [vmem:[%s645_s1 + $0x28] sm:$0xff]  ;;  %v41_v7 = vld [vmem:[%s646_s2 + $0x18] sm:$0xff] }
   0x5   :  { %390 = vmatpush.msk.msra.mxu0 %vm111_vm0, %v29_v1  ;;  %407 = vmatpush.msk.msra.mxu3 %vm111_vm0, %v29_v1  ;;  %v44_v8 = vld [vmem:[%s646_s2 + $0x30] sm:$0xff]  ;;  %v42_v9 = vld [vmem:[%s646_s2 + $0x20] sm:$0xff] }
   0x6   :  { %83 = vperm.xlu0 %426, %v45_v2   ;;  %73 = vperm.xlu1 %427, %v43_v3  }
   0x7   :  { %391 = vmatmul.msk.f32.vlgmr.msra.gmra.mxu0 %vm86_vm1, %v30_v5  ;;  %396 = vmatmul.msk.f32.vlgmr.msra.gmra.mxu3 %vm86_vm1, %v35_v6 }
   0x8   :  { %428 = vset.pattern.permute.xlu2 %v457_v4 }
   0x9   :  { %63 = vperm.xlu2 %428, %v41_v7  }
   0xa   :  { %14 = vsyncpa [#allocation4], 0  ;;  %v31_v10 = vld [vmem:[%s645_s1 + $0x8] sm:$0xff]  ;;  %v36_v11 = vld [vmem:[%s645_s1 + $0x30] sm:$0xff]  ;;  %vm220_vm2 = vcmask 523264   ;;  %s381_s30 = sshll.u32 %s651_s7, 4  ;;  %s382_s30 = int_to_ptr.hbm [resolvable:$true] %s381_s30 }
   0xb   :  { %v40_v12 = vld [vmem:[%s646_s2 + $0x10] sm:$0xff]  ;;  %v39_v13 = vld [vmem:[%s646_s2 + $0x8] sm:$0xff]  ;;  %v38_v14 = vld [vmem:[%s646_s2] sm:$0xff] }
   0xc   :  { %v32_v15 = vld [vmem:[%s645_s1 + $0x10] sm:$0xff]  ;;  %v37_v16 = vld [vmem:[%s645_s1 + $0x38] sm:$0xff]  ;;  %v172_v17 = vld [vmem:[%s648_s4] sm:$0xff] }
   0xd   :  { %v173_v18 = vld [vmem:[%s648_s4 + $0x8] sm:$0xff]  ;;  %v174_v19 = vld [vmem:[%s648_s4 + $0x10] sm:$0xff]  ;;  %v33_v20 = vld [vmem:[%s645_s1 + $0x18] sm:$0xff] }
   0xe   :  { %78 = vperm.xlu0 %426, %v44_v8   ;;  %68 = vperm.xlu1 %427, %v42_v9   ;;  %v175_v21 = vld [vmem:[%s648_s4 + $0x18] sm:$0xff]  ;;  %v294_v22 = vld [vmem:[%s649_s5] sm:$0xff]  ;;  %v295_v23 = vld [vmem:[%s649_s5 + $0x8] sm:$0xff] }
   0xf   :  { %392 = vmatmul.msk.f32.gmra.mxu0 %vm86_vm1, %v31_v10  ;;  %397 = vmatmul.msk.f32.gmra.mxu3 %vm86_vm1, %v36_v11  ;;  %v34_v24 = vld [vmem:[%s645_s1 + $0x20] sm:$0xff]  ;;  %v296_v26 = vld [vmem:[%s649_s5 + $0x10] sm:$0xff]  ;;  %v177_v27 = vld [vmem:[%s648_s4 + $0x28] sm:$0xff] }
  0x10   :  { %v176_v25 = vld [vmem:[%s648_s4 + $0x20] sm:$0xff]  ;;  %v297_v28 = vld [vmem:[%s649_s5 + $0x18] sm:$0xff]  ;;  %v178_v29 = vld [vmem:[%s648_s4 + $0x30] sm:$0xff] }
  0x11   :  { %58 = vperm.xlu2 %428, %v40_v12   ;;  %v298_v30 = vld [vmem:[%s649_s5 + $0x20] sm:$0xff]  ;;  %v179_v31 = vld [vmem:[%s648_s4 + $0x38] sm:$0xff]  ;;  %v299_v32 = vld [vmem:[%s649_s5 + $0x28] sm:$0xff] }
  0x12   :  { %v300_v33 = vld [vmem:[%s649_s5 + $0x30] sm:$0xff]  ;;  %v301_v34 = vld [vmem:[%s649_s5 + $0x38] sm:$0xff]  ;;  %v363_v35 = vld [vmem:[#allocation2] sm:$0x1] }
  0x13   :  { %v164_v4 = vld [vmem:[%s647_s3] sm:$0xff]  ;;  %v167_v5 = vld [vmem:[%s647_s3 + $0x18] sm:$0xff]  ;;  %v165_v7 = vld [vmem:[%s647_s3 + $0x8] sm:$0xff] }
  0x14   :  { %v171_v6 = vld [vmem:[%s647_s3 + $0x38] sm:$0xff]  ;;  %v168_v8 = vld [vmem:[%s647_s3 + $0x20] sm:$0xff]  ;;  %v166_v9 = vld [vmem:[%s647_s3 + $0x10] sm:$0xff] }
  0x15   :  { %v169_v10 = vld [vmem:[%s647_s3 + $0x28] sm:$0xff]  ;;  %v170_v11 = vld [vmem:[%s647_s3 + $0x30] sm:$0xff]  ;;  %s458_s3 = smov [#allocation3]  }
  0x16   :  { %53 = vperm.xlu0 %426, %v39_v13   ;;  %48 = vperm.xlu1 %427, %v38_v14   ;;  %s379_s27 = sshll.u32 %s458_s3, 4  ;;  %s380_s27 = int_to_ptr.vmem [resolvable:$true] %s379_s27 }
  0x17   :  { %393 = vmatmul.msk.f32.gmra.mxu0 %vm86_vm1, %v32_v15  ;;  %398 = vmatmul.msk.f32.gmra.mxu3 %vm86_vm1, %v37_v16 }
  0x19   :  { %182 = vperm.xlu2 %428, %v172_v17  }
  0x1e   :  { %187 = vperm.xlu0 %426, %v173_v18   ;;  %192 = vperm.xlu1 %427, %v174_v19  }
  0x1f   :  { %394 = vmatmul.msk.f32.gmra.mxu0 %vm86_vm1, %v33_v20 }
  0x21   :  { %197 = vperm.xlu2 %428, %v175_v21  }
  0x26   :  { %304 = vperm.xlu0 %426, %v294_v22   ;;  %309 = vperm.xlu1 %427, %v295_v23  }
  0x27   :  { %395 = vmatmul.msk.f32.gmra.mxu0 %vm86_vm1, %v34_v24 }
  0x29   :  { %202 = vperm.xlu2 %428, %v176_v25  }
  0x2e   :  { %314 = vperm.xlu0 %426, %v296_v26   ;;  %207 = vperm.xlu1 %427, %v177_v27  }
  0x31   :  { %319 = vperm.xlu2 %428, %v297_v28  }
  0x36   :  { %212 = vperm.xlu0 %426, %v178_v29   ;;  %324 = vperm.xlu1 %427, %v298_v30  }
  0x39   :  { %217 = vperm.xlu2 %428, %v179_v31  }
  0x3e   :  { %329 = vperm.xlu0 %426, %v299_v32   ;;  %334 = vperm.xlu1 %427, %v300_v33  }
  0x41   :  { %339 = vperm.xlu2 %428, %v301_v34  }
  0x46   :  { %366 = vperm.xlu0 %426, %v363_v35  }
  0x63   :  { %v64_v47 = vpop.permute.xlu2 %63 }
  0x6b   :  { %v59_v57 = vpop.permute.xlu2 %58 }
  0x73   :  { %v183_v12 = vpop.permute.xlu2 %182 }
  0x78   :  { %v84_v39 = vpop.permute.xlu0 %83  ;;  %v74_v41 = vpop.permute.xlu1 %73 }
  0x7b   :  { %v198_v15 = vpop.permute.xlu2 %197 }
  0x80   :  { %v79_v43 = vpop.permute.xlu0 %78  ;;  %v69_v51 = vpop.permute.xlu1 %68 }
  0x83   :  { %v203_v19 = vpop.permute.xlu2 %202 }
  0x84   :  { %v132_v36 = vpop.f32.mrf.mxu0 }
  0x88   :  { %v54_v60 = vpop.permute.xlu0 %53  ;;  %v49_v61 = vpop.permute.xlu1 %48 }
  0x89   :  { %v133_v0 = vadd.f32 %v132_v36, %v49_v61 }
  0x8a   :  { %v147_v37 = vpop.f32.mrf.mxu3 }
  0x8b   :  { %v148_v49 = vadd.f32 %v147_v37, %v74_v41  ;;  %v156_v3 = vmax.f32 %v133_v0, 0.0  ;;  %v320_v30 = vpop.permute.xlu2 %319 }
  0x8c   :  { %v135_v38 = vpop.f32.mrf.mxu0 }
  0x8d   :  { %v161_v53 = vmax.f32 %v148_v49, 0.0  ;;  %v136_v62 = vadd.f32 %v135_v38, %v54_v60 }
  0x8f   :  { %v157_v2 = vmax.f32 %v136_v62, 0.0 }
  0x90   :  { %v188_v13 = vpop.permute.xlu0 %187  ;;  %v193_v14 = vpop.permute.xlu1 %192 }
  0x92   :  { %v150_v40 = vpop.f32.mrf.mxu3 }
  0x93   :  { %v151_v45 = vadd.f32 %v150_v40, %v79_v43 }
  0x94   :  { %v138_v42 = vpop.f32.mrf.mxu0 }
  0x95   :  { %v162_v52 = vmax.f32 %v151_v45, 0.0  ;;  %v139_v58 = vadd.f32 %v138_v42, %v59_v57 }
  0x97   :  { %v158_v1 = vmax.f32 %v139_v58, 0.0 }
  0x98   :  { %v305_v17 = vpop.permute.xlu0 %304  ;;  %v310_v18 = vpop.permute.xlu1 %309 }
  0x9a   :  { %v153_v44 = vpop.f32.mrf.mxu3 }
  0x9b   :  { %v154_v46 = vadd.f32 %v153_v44, %v84_v39 }
  0x9c   :  { %v141_v48 = vpop.f32.mrf.mxu0 }
  0x9d   :  { %v163_v50 = vmax.f32 %v154_v46, 0.0  ;;  %v142_v55 = vadd.f32 %v141_v48, %v64_v47  ;;  %v218_v47 = vpop.permute.xlu2 %217 }
  0x9f   :  { %253 = vmatpush.msra.mxu1 %v163_v50  ;;  %408 = vmatpush.msra.mxu2 %v163_v50  ;;  %v159_v63 = vmax.f32 %v142_v55, 0.0 }
  0xa0   :  { %409 = vmatpush.msrb.mxu3 %v163_v50  ;;  %v315_v23 = vpop.permute.xlu0 %314  ;;  %v208_v26 = vpop.permute.xlu1 %207 }
  0xa1   :  { %254 = vmatpush.msra.mxu1 %v162_v52  ;;  %410 = vmatpush.msra.mxu2 %v162_v52 }
  0xa2   :  { %411 = vmatpush.msrb.mxu3 %v162_v52 }
  0xa3   :  { %255 = vmatpush.msra.mxu1 %v161_v53  ;;  %412 = vmatpush.msra.mxu2 %v161_v53 }
  0xa4   :  { %413 = vmatpush.msrb.mxu3 %v161_v53  ;;  %v144_v54 = vpop.f32.mrf.mxu0 }
  0xa5   :  { %v145_v56 = vadd.f32 %v144_v54, %v69_v51 }
  0xa7   :  { %v160_v59 = vmax.f32 %v145_v56, 0.0 }
  0xa8   :  { %v213_v36 = vpop.permute.xlu0 %212  ;;  %v325_v44 = vpop.permute.xlu1 %324 }
  0xa9   :  { %256 = vmatpush.msra.mxu1 %v160_v59  ;;  %414 = vmatpush.msra.mxu2 %v160_v59 }
  0xaa   :  { %415 = vmatpush.msrb.mxu3 %v160_v59 }
  0xab   :  { %257 = vmatpush.msra.mxu1 %v159_v63  ;;  %416 = vmatpush.msra.mxu2 %v159_v63 }
  0xac   :  { %417 = vmatpush.msrb.mxu3 %v159_v63  ;;  %v340_v63 = vpop.permute.xlu2 %339 }
  0xad   :  { %258 = vmatpush.msra.mxu1 %v158_v1  ;;  %418 = vmatpush.msra.mxu2 %v158_v1 }
  0xae   :  { %419 = vmatpush.msrb.mxu3 %v158_v1 }
  0xaf   :  { %259 = vmatpush.msra.mxu1 %v157_v2  ;;  %420 = vmatpush.msra.mxu2 %v157_v2 }
  0xb0   :  { %421 = vmatpush.msrb.mxu3 %v157_v2  ;;  %v330_v53 = vpop.permute.xlu0 %329  ;;  %v335_v60 = vpop.permute.xlu1 %334 }
  0xb1   :  { %260 = vmatpush.msra.mxu1 %v156_v3  ;;  %422 = vmatpush.msra.mxu2 %v156_v3 }
  0xb2   :  { %423 = vmatpush.msrb.mxu3 %v156_v3  ;;  %399 = vmatmul.msk.f32.vlgmr.msra.gmra.mxu1 %vm220_vm2, %v164_v4 }
  0xb3   :  { %402 = vmatmul.msk.f32.vlgmr.msra.gmra.mxu2 %vm220_vm2, %v167_v5  ;;  %406 = vmatmul.msk.f32.vlgmr.msrb.gmra.mxu3 %vm220_vm2, %v171_v6 }
  0xba   :  { %400 = vmatmul.msk.f32.gmra.mxu1 %vm220_vm2, %v165_v7  ;;  %v367_v7 = vpop.permute.xlu0 %366 }
  0xbb   :  { %403 = vmatmul.msk.f32.gmra.mxu2 %vm220_vm2, %v168_v8 }
  0xc2   :  { %401 = vmatmul.msk.f32.gmra.mxu1 %vm220_vm2, %v166_v9  ;;  %v369_v9 = vperm.slane %v367_v7, 0 }
  0xc3   :  { %404 = vmatmul.msk.f32.gmra.mxu2 %vm220_vm2, %v169_v10 }
  0xcb   :  { %405 = vmatmul.msk.f32.gmra.mxu2 %vm220_vm2, %v170_v11 }
 0x12f   :  { %v262_v16 = vpop.f32.mrf.mxu1 }
 0x130   :  { %v263_v24 = vadd.f32 %v262_v16, %v183_v12 }
 0x132   :  { %v286_v28 = vmax.f32 %v263_v24, 0.0 }
 0x134   :  { %v342_v35 = vmul.f32 %v305_v17, %v286_v28 }
 0x136   :  { %v271_v20 = vpop.f32.mrf.mxu2  ;;  %v283_v48 = vpop.f32.mrf.mxu3 }
 0x137   :  { %v265_v21 = vpop.f32.mrf.mxu1  ;;  %v272_v32 = vadd.f32 %v271_v20, %v198_v15  ;;  %v284_v51 = vadd.f32 %v283_v48, %v218_v47 }
 0x138   :  { %v266_v22 = vadd.f32 %v265_v21, %v188_v13 }
 0x139   :  { %v289_v38 = vmax.f32 %v272_v32, 0.0  ;;  %v293_v58 = vmax.f32 %v284_v51, 0.0 }
 0x13a   :  { %v287_v25 = vmax.f32 %v266_v22, 0.0 }
 0x13b   :  { %v345_v45 = vmul.f32 %v320_v30, %v289_v38  ;;  %v349_v0 = vmul.f32 %v340_v63, %v293_v58 }
 0x13c   :  { %v343_v33 = vmul.f32 %v310_v18, %v287_v25 }
 0x13e   :  { %v274_v27 = vpop.f32.mrf.mxu2  ;;  %v350_v39 = vadd.f32 %v343_v33, %v342_v35 }
 0x13f   :  { %v268_v29 = vpop.f32.mrf.mxu1  ;;  %v275_v40 = vadd.f32 %v274_v27, %v203_v19 }
 0x140   :  { %v269_v31 = vadd.f32 %v268_v29, %v193_v14 }
 0x141   :  { %v290_v46 = vmax.f32 %v275_v40, 0.0 }
 0x142   :  { %v288_v34 = vmax.f32 %v269_v31, 0.0 }
 0x143   :  { %v346_v52 = vmul.f32 %v325_v44, %v290_v46 }
 0x144   :  { %v344_v37 = vmul.f32 %v315_v23, %v288_v34 }
 0x146   :  { %v277_v41 = vpop.f32.mrf.mxu2  ;;  %v351_v42 = vadd.f32 %v350_v39, %v344_v37 }
 0x147   :  { %v278_v43 = vadd.f32 %v277_v41, %v208_v26 }
 0x148   :  { %v352_v49 = vadd.f32 %v351_v42, %v345_v45 }
 0x149   :  { %v291_v50 = vmax.f32 %v278_v43, 0.0 }
 0x14a   :  { %v353_v56 = vadd.f32 %v352_v49, %v346_v52 }
 0x14b   :  { %v347_v55 = vmul.f32 %v330_v53, %v291_v50 }
 0x14d   :  { %v354_v61 = vadd.f32 %v353_v56, %v347_v55 }
 0x14e   :  { %v280_v54 = vpop.f32.mrf.mxu2 }
 0x14f   :  { %v281_v57 = vadd.f32 %v280_v54, %v213_v36 }
 0x151   :  { %v292_v59 = vmax.f32 %v281_v57, 0.0 }
 0x153   :  { %v348_v62 = vmul.f32 %v335_v60, %v292_v59 }
 0x155   :  { %v355_v1 = vadd.f32 %v354_v61, %v348_v62 }
 0x157   :  { %v356_v2 = vadd.f32 %v355_v1, %v349_v0 }
 0x159   :  { %v357_v3 = vrot.slane %v356_v2, 4 }
 0x15b   :  { %v358_v4 = vadd.f32 %v357_v3, %v356_v2 }
 0x15d   :  { %v359_v5 = vrot.slane %v358_v4, 2 }
 0x15f   :  { %v360_v6 = vadd.f32 %v359_v5, %v358_v4 }
 0x161   :  { %v361_v8 = vrot.slane %v360_v6, 1 }
 0x163   :  { %v362_v10 = vadd.f32 %v361_v8, %v360_v6 }
 0x165   :  { %v370_v11 = vadd.f32 %v369_v9, %v362_v10 }
 0x167   :  { %429 = vtanh.f32 %v370_v11 }
 0x16d   :  { %v430_v12 = vpop.eup %429 }
 0x16e   :  { %v372_v13 = vmul.f32 2.0, %v430_v12 }
 0x170   :  { %373 = vst [vmem:[#allocation3] sm:$0x1] %v372_v13 }
 0x171   :  { %384 = dma.vmem_to_hbm [thread:$0]  %s380_s27, 16, %s382_s30, [#allocation4]  }
 0x172   :  { %455 = dma.done.wait [#allocation4], 16  }
 0x173   :  { %456 = vsyncadd [#allocation4], 4294967280 }
 0x174   :  { %389 = vsyncpa [#allocation4], 1 }

</bundles_post_ra>
